<compile_context>
chip_gen: v7x
topology: tpu7x:2x2x1
jax: 0.10.0
libtpu: 0.0.40
codegen_flags: <defaults>
</compile_context>

<pallas_src>
import jax
import jax.numpy as jnp
from jax.experimental import pallas as pl
from jax.experimental.pallas import tpu as pltpu

LANES = 128
TARGET_BLOCK_BYTES = 2 << 20   # HBM bytes per input per pipeline buffer (~2 MiB)
CHUNK_ROWS = 1024              # inner-loop chunk: ~512 KiB f32 temporaries per op
MAX_CORES = 2                  # leading "parallel" grid axis (v7x megacore)
MIN_KERNEL_ELEMS = 8 * LANES   # below one (8,128) tile, pure JAX is faster


def _reduce_sums(pred2d, true2d, k_shift, n):
    """Per-core per-lane partial sums, shape (num_cores, 4, 8, 128).

    Statistic layout along axis 1:
      0: sum((pred - true)^2)   (ss_res / MSE numerator)
      1: sum(|pred - true|)     (MAE numerator)
      2: sum(true - K)          (shifted mean numerator)
      3: sum((true - K)^2)      (shifted ss_tot numerator)
    Elements beyond the logical extent n (lane padding, partial last block,
    per-core overhang) are masked to zero inside the kernel.
    """
    rows, lanes = pred2d.shape
    assert lanes == LANES and rows >= 8

    itemsize = max(pred2d.dtype.itemsize, true2d.dtype.itemsize)
    max_rows = max(8, (TARGET_BLOCK_BYTES // (LANES * itemsize)) // 8 * 8)
    block_rows = min(max_rows, (rows // 8) * 8)          # multiple of 8, <= rows
    chunk_rows = CHUNK_ROWS if block_rows % CHUNK_ROWS == 0 else block_rows
    num_chunks = block_rows // chunk_rows

    total_blocks = -(-rows // block_rows)
    num_cores = min(MAX_CORES, total_blocks)
    steps = -(-total_blocks // num_cores)                 # streaming steps/core
    covered_rows = num_cores * steps * block_rows
    full_rows, rem = divmod(n, LANES)
    needs_mask = covered_rows * LANES != n                # static (trace-time)

    def in_map(c, i):
        # Clamp per-core overhang steps onto the last real block; their
        # contribution is masked to zero inside the kernel.
        return (jnp.minimum(c * steps + i, total_blocks - 1), 0)

    def kernel(p_ref, t_ref, k_ref, out_ref):
        c = pl.program_id(0)
        i = pl.program_id(1)

        @pl.when(i == 0)
        def _():
            out_ref[...] = jnp.zeros_like(out_ref)

        k = k_ref[0, 0]
        # UNclamped row origin: overhang steps land entirely past full_rows and
        # therefore mask to zero even though they re-read the last real block.
        base_row = (c * steps + i) * block_rows

        def chunk_stats(r0):
            p = p_ref[pl.ds(r0, chunk_rows), :].astype(jnp.float32)
            t = t_ref[pl.ds(r0, chunk_rows), :].astype(jnp.float32)
            if needs_mask:
                grow = (base_row + r0) + jax.lax.broadcasted_iota(
                    jnp.int32, (chunk_rows, LANES), 0)
                if rem == 0:
                    valid = grow < full_rows
                else:
                    lane = jax.lax.broadcasted_iota(
                        jnp.int32, (chunk_rows, LANES), 1)
                    valid = (grow < full_rows) | ((grow == full_rows) & (lane < rem))
                d = jnp.where(valid, p - t, 0.0)
                tc = jnp.where(valid, t - k, 0.0)
            else:
                d = p - t
                tc = t - k

            def fold(x):
                # (chunk_rows, 128) -> (8, 128): layout-preserving reshape +
                # vector adds — stays on the VPU, no cross-lane XLU reduce.
                return jnp.sum(x.reshape(chunk_rows // 8, 8, LANES), axis=0)

            return fold(d * d), fold(jnp.abs(d)), fold(tc), fold(tc * tc)

        if num_chunks == 1:
            s0, s1, s2, s3 = chunk_stats(0)
        else:
            def body(ci, carry):
                r0 = pl.multiple_of(ci * chunk_rows, chunk_rows)
                part = chunk_stats(r0)
                return tuple(a + b for a, b in zip(carry, part))

            zero = jnp.zeros((8, LANES), jnp.float32)
            s0, s1, s2, s3 = jax.lax.fori_loop(
                0, num_chunks, body, (zero, zero, zero, zero))

        out_ref[0, 0] += s0
        out_ref[0, 1] += s1
        out_ref[0, 2] += s2
        out_ref[0, 3] += s3

    bytes_accessed = (n * pred2d.dtype.itemsize
                      + n * true2d.dtype.itemsize
                      + num_cores * 4 * 8 * LANES * 4)
    return pl.pallas_call(
        kernel,
        out_shape=jax.ShapeDtypeStruct((num_cores, 4, 8, LANES), jnp.float32),
        grid_spec=pltpu.PrefetchScalarGridSpec(
            num_scalar_prefetch=0,
            grid=(num_cores, steps),
            in_specs=[
                pl.BlockSpec((block_rows, LANES), in_map),
                pl.BlockSpec((block_rows, LANES), in_map),
                pl.BlockSpec(memory_space=pltpu.SMEM),    # K shift scalar (1,1)
            ],
            out_specs=pl.BlockSpec((1, 4, 8, LANES), lambda c, i: (c, 0, 0, 0)),
        ),
        compiler_params=pltpu.CompilerParams(
            dimension_semantics=("parallel", "arbitrary"),
        ),
        cost_estimate=pl.CostEstimate(
            flops=9 * n, transcendentals=0, bytes_accessed=bytes_accessed),
    )(pred2d, true2d, k_shift)


def _loss_terms_ref(y_pred, y_true):
    """Pure-JAX reference / tiny-input fallback (matches the PyTorch formulas)."""
    p = jnp.ravel(y_pred).astype(jnp.float32)
    t = jnp.ravel(y_true).astype(jnp.float32)
    d = p - t
    mse = jnp.mean(d * d)
    mae = jnp.mean(jnp.abs(d))
    ss_tot = jnp.sum((t - jnp.mean(t)) ** 2)
    ss_res = jnp.sum(d * d)
    r2 = 1.0 - ss_res / (ss_tot + 1e-8)
    return mse, mae, r2


def custom_loss(y_pred, y_true, mse_weight=0.4, mae_weight=0.3, r2_weight=0.3):
    """JAX/Pallas implementation of CustomLoss.forward.

    Returns (total_loss, mse_loss, mae_loss, r2) as f32 scalars; all reductions
    are taken over every element, matching the PyTorch reference semantics.
    """
    n = int(y_pred.size)
    if n < MIN_KERNEL_ELEMS:
        # Kernel launch / pipeline prologue dominates for tiny inputs.
        mse, mae, r2 = _loss_terms_ref(y_pred, y_true)
        total = mse_weight * mse + mae_weight * mae + r2_weight * (1.0 - r2)
        return total, mse, mae, r2

    flat_p = jnp.ravel(y_pred)   # free reshapes; keep original dtype — the
    flat_t = jnp.ravel(y_true)   # kernel casts in-register (no 2x HBM traffic)
    k_shift = flat_t[0].astype(jnp.float32).reshape(1, 1)

    if n % LANES:
        # TODO(synk): the rare lane-misaligned tail still costs one pad copy;
        # a fully copy-free path would need a separate 1-D tail kernel.
        pad = LANES - n % LANES
        flat_p = jnp.pad(flat_p, (0, pad))
        flat_t = jnp.pad(flat_t, (0, pad))
    rows = flat_p.size // LANES
    pred2d = flat_p.reshape(rows, LANES)
    true2d = flat_t.reshape(rows, LANES)

    partials = _reduce_sums(pred2d, true2d, k_shift, n)
    sums = jnp.sum(partials, axis=(0, 2, 3))   # (4,) — tiny final reduce

    n_f = jnp.float32(n)
    ss_res = sums[0]
    mse = ss_res / n_f
    mae = sums[1] / n_f
    # Shifted-variance form of sum((t - mean(t))^2): stable when |mean| >> std.
    ss_tot = sums[3] - (sums[2] * sums[2]) / n_f
    r2 = 1.0 - ss_res / (ss_tot + 1e-8)
    r2_loss = 1.0 - r2
    total = mse_weight * mse + mae_weight * mae + r2_weight * r2_loss
    return total, mse, mae, r2


if __name__ == "__main__":
    key = jax.random.PRNGKey(0)

    # Regression-style (batch, out_dim) shapes exercising every code path:
    #   (72, 32)    masked small-block path, both "cores"
    #   (1024, 512) unmasked single-block path with inner chunk loop
    #   (2048, 640) masked multi-step / multi-core path with overhang clamp
    #   (45, 31)    lane-padded tail path
    #   (16, 8)     tiny pure-JAX fallback
    shapes = [(72, 32), (1024, 512), (2048, 640), (45, 31), (16, 8)]
    keys = jax.random.split(key, 2 * len(shapes) + 2)

    for idx, shape in enumerate(shapes):
        kp, kt = keys[2 * idx], keys[2 * idx + 1]
        y_pred = jax.random.normal(kp, shape, dtype=jnp.float32)
        y_true = y_pred + 0.1 * jax.random.normal(kt, shape, dtype=jnp.float32)

        total, mse, mae, r2 = custom_loss(y_pred, y_true)
        jax.block_until_ready(total)

        mse_ref, mae_ref, r2_ref = _loss_terms_ref(y_pred, y_true)
        total_ref = 0.4 * mse_ref + 0.3 * mae_ref + 0.3 * (1.0 - r2_ref)

        assert jnp.allclose(mse, mse_ref, rtol=1e-4, atol=1e-6), shape
        assert jnp.allclose(mae, mae_ref, rtol=1e-4, atol=1e-6), shape
        assert jnp.allclose(r2, r2_ref, rtol=1e-4, atol=1e-5), shape
        assert jnp.allclose(total, total_ref, rtol=1e-4, atol=1e-5), shape

    # bf16 input path (in-kernel cast, dtype-aware larger tile).
    kp, kt = keys[-2], keys[-1]
    y_pred = jax.random.normal(kp, (512, 384), dtype=jnp.bfloat16)
    y_true = (y_pred.astype(jnp.float32)
              + 0.1 * jax.random.normal(kt, (512, 384), dtype=jnp.float32)
              ).astype(jnp.bfloat16)
    total, mse, mae, r2 = custom_loss(y_pred, y_true)
    jax.block_until_ready(total)
    mse_ref, mae_ref, r2_ref = _loss_terms_ref(y_pred, y_true)
    total_ref = 0.4 * mse_ref + 0.3 * mae_ref + 0.3 * (1.0 - r2_ref)
    assert jnp.allclose(mse, mse_ref, rtol=5e-3, atol=1e-5)
    assert jnp.allclose(mae, mae_ref, rtol=5e-3, atol=1e-5)
    assert jnp.allclose(r2, r2_ref, rtol=5e-3, atol=1e-4)
    assert jnp.allclose(total, total_ref, rtol=5e-3, atol=1e-4)

    print("KERNEL_OK")
</pallas_src>

<mosaic_0001>
module attributes {stable_mosaic.version = 11 : i64} {
  func.func @kernel(%arg0: i32, %arg1: i32, %arg2: memref<16x128xf32, #tpu.memory_space<vmem>>, %arg3: memref<16x128xf32, #tpu.memory_space<vmem>>, %arg4: memref<1x1xf32, #tpu.memory_space<smem>>, %arg5: memref<1x4x8x128xf32, #tpu.memory_space<vmem>>) attributes {dimension_semantics = [#tpu.dimension_semantics<parallel>, #tpu.dimension_semantics<arbitrary>], iteration_bounds = array<i64: 2, 1>, scalar_prefetch = 0 : i64, scratch_operands = 0 : i64, tpu.core_type = #tpu.core_type<tc>, window_params = [{transform_indices = @transform_0, window_bounds = array<i64: 16, 128>}, {transform_indices = @transform_1, window_bounds = array<i64: 16, 128>}, {transform_indices = @transform_2, window_bounds = array<i64: 1, 1>}, {transform_indices = @transform_3, window_bounds = array<i64: 1, 4, 8, 128>}]} {
    %c0_i32 = arith.constant 0 : i32
    %0 = arith.cmpi eq, %arg1, %c0_i32 : i32
    %1 = arith.extui %0 : i1 to i32
    %c0_i32_0 = arith.constant 0 : i32
    %2 = arith.cmpi ne, %1, %c0_i32_0 : i32
    scf.if %2 {
      %cst_41 = arith.constant 0.000000e+00 : f32
      %57 = vector.broadcast %cst_41 : f32 to vector<1x4x8x128xf32>
      %c0_42 = arith.constant 0 : index
      %c0_43 = arith.constant 0 : index
      %c0_44 = arith.constant 0 : index
      %c0_45 = arith.constant 0 : index
      %58 = vector.load %arg5[%c0_42, %c0_43, %c0_44, %c0_45] : memref<1x4x8x128xf32, #tpu.memory_space<vmem>>, vector<1x4x8x128xf32>
      tpu.vector_store %arg5[%c0_42, %c0_43, %c0_44, %c0_45], %57 {strides = array<i32>} : memref<1x4x8x128xf32, #tpu.memory_space<vmem>>, vector<1x4x8x128xf32>,
    } else {
    }
    %c0 = arith.constant 0 : index
    %c0_1 = arith.constant 0 : index
    %3 = memref.load %arg4[%c0, %c0_1] : memref<1x1xf32, #tpu.memory_space<smem>>
    %c1_i32 = arith.constant 1 : i32
    %4 = arith.muli %arg0, %c1_i32 : i32
    %5 = arith.addi %4, %arg1 : i32
    %c16_i32 = arith.constant 16 : i32
    %6 = arith.muli %5, %c16_i32 : i32
    %c0_2 = arith.constant 0 : index
    %c0_3 = arith.constant 0 : index
    %7 = vector.load %arg2[%c0_2, %c0_3] : memref<16x128xf32, #tpu.memory_space<vmem>>, vector<16x128xf32>
    %c0_4 = arith.constant 0 : index
    %c0_5 = arith.constant 0 : index
    %8 = vector.load %arg3[%c0_4, %c0_5] : memref<16x128xf32, #tpu.memory_space<vmem>>, vector<16x128xf32>
    %c0_i32_6 = arith.constant 0 : i32
    %9 = arith.addi %6, %c0_i32_6 : i32
    %10 = tpu.iota {dimensions = array<i32: 0>} : vector<16x128xi32>
    %11 = vector.broadcast %9 : i32 to vector<16x128xi32>
    %12 = arith.addi %11, %10 : vector<16x128xi32>
    %c18_i32 = arith.constant 18 : i32
    %13 = vector.broadcast %c18_i32 : i32 to vector<16x128xi32>
    %14 = arith.cmpi slt, %12, %13 : vector<16x128xi32>
    %15 = arith.subf %7, %8 : vector<16x128xf32>
    %cst = arith.constant 0.000000e+00 : f32
    %16 = vector.broadcast %cst : f32 to vector<16x128xf32>
    %17 = arith.select %14, %15, %16 : vector<16x128xi1>, vector<16x128xf32>
    %18 = vector.broadcast %3 : f32 to vector<16x128xf32>
    %19 = arith.subf %8, %18 : vector<16x128xf32>
    %cst_7 = arith.constant 0.000000e+00 : f32
    %20 = vector.broadcast %cst_7 : f32 to vector<16x128xf32>
    %21 = arith.select %14, %19, %20 : vector<16x128xi1>, vector<16x128xf32>
    %22 = arith.mulf %17, %17 : vector<16x128xf32>
    %23 = vector.shape_cast %22 : vector<16x128xf32> to vector<2x8x128xf32>
    %cst_8 = arith.constant dense<0.000000e+00> : vector<8x128xf32>
    %24 = vector.multi_reduction <add>, %23, %cst_8 [0] : vector<2x8x128xf32> to vector<8x128xf32>
    %25 = math.absf %17 : vector<16x128xf32>
    %26 = vector.shape_cast %25 : vector<16x128xf32> to vector<2x8x128xf32>
    %cst_9 = arith.constant dense<0.000000e+00> : vector<8x128xf32>
    %27 = vector.multi_reduction <add>, %26, %cst_9 [0] : vector<2x8x128xf32> to vector<8x128xf32>
    %28 = vector.shape_cast %21 : vector<16x128xf32> to vector<2x8x128xf32>
    %cst_10 = arith.constant dense<0.000000e+00> : vector<8x128xf32>
    %29 = vector.multi_reduction <add>, %28, %cst_10 [0] : vector<2x8x128xf32> to vector<8x128xf32>
    %30 = arith.mulf %21, %21 : vector<16x128xf32>
    %31 = vector.shape_cast %30 : vector<16x128xf32> to vector<2x8x128xf32>
    %cst_11 = arith.constant dense<0.000000e+00> : vector<8x128xf32>
    %32 = vector.multi_reduction <add>, %31, %cst_11 [0] : vector<2x8x128xf32> to vector<8x128xf32>
    %c0_12 = arith.constant 0 : index
    %c0_13 = arith.constant 0 : index
    %c0_14 = arith.constant 0 : index
    %c0_15 = arith.constant 0 : index
    %33 = vector.load %arg5[%c0_12, %c0_13, %c0_14, %c0_15] : memref<1x4x8x128xf32, #tpu.memory_space<vmem>>, vector<1x1x8x128xf32>
    %34 = vector.shape_cast %33 : vector<1x1x8x128xf32> to vector<8x128xf32>
    %35 = arith.addf %34, %24 : vector<8x128xf32>
    %c0_16 = arith.constant 0 : index
    %c0_17 = arith.constant 0 : index
    %c0_18 = arith.constant 0 : index
    %c0_19 = arith.constant 0 : index
    %36 = vector.load %arg5[%c0_16, %c0_17, %c0_18, %c0_19] : memref<1x4x8x128xf32, #tpu.memory_space<vmem>>, vector<1x1x8x128xf32>
    %37 = vector.shape_cast %36 : vector<1x1x8x128xf32> to vector<8x128xf32>
    %38 = vector.shape_cast %35 : vector<8x128xf32> to vector<1x1x8x128xf32>
    tpu.vector_store %arg5[%c0_16, %c0_17, %c0_18, %c0_19], %38 {strides = array<i32>} : memref<1x4x8x128xf32, #tpu.memory_space<vmem>>, vector<1x1x8x128xf32>,
    %c0_20 = arith.constant 0 : index
    %c1 = arith.constant 1 : index
    %c0_21 = arith.constant 0 : index
    %c0_22 = arith.constant 0 : index
    %39 = vector.load %arg5[%c0_20, %c1, %c0_21, %c0_22] : memref<1x4x8x128xf32, #tpu.memory_space<vmem>>, vector<1x1x8x128xf32>
    %40 = vector.shape_cast %39 : vector<1x1x8x128xf32> to vector<8x128xf32>
    %41 = arith.addf %40, %27 : vector<8x128xf32>
    %c0_23 = arith.constant 0 : index
    %c1_24 = arith.constant 1 : index
    %c0_25 = arith.constant 0 : index
    %c0_26 = arith.constant 0 : index
    %42 = vector.load %arg5[%c0_23, %c1_24, %c0_25, %c0_26] : memref<1x4x8x128xf32, #tpu.memory_space<vmem>>, vector<1x1x8x128xf32>
    %43 = vector.shape_cast %42 : vector<1x1x8x128xf32> to vector<8x128xf32>
    %44 = vector.shape_cast %41 : vector<8x128xf32> to vector<1x1x8x128xf32>
    tpu.vector_store %arg5[%c0_23, %c1_24, %c0_25, %c0_26], %44 {strides = array<i32>} : memref<1x4x8x128xf32, #tpu.memory_space<vmem>>, vector<1x1x8x128xf32>,
    %c0_27 = arith.constant 0 : index
    %c2 = arith.constant 2 : index
    %c0_28 = arith.constant 0 : index
    %c0_29 = arith.constant 0 : index
    %45 = vector.load %arg5[%c0_27, %c2, %c0_28, %c0_29] : memref<1x4x8x128xf32, #tpu.memory_space<vmem>>, vector<1x1x8x128xf32>
    %46 = vector.shape_cast %45 : vector<1x1x8x128xf32> to vector<8x128xf32>
    %47 = arith.addf %46, %29 : vector<8x128xf32>
    %c0_30 = arith.constant 0 : index
    %c2_31 = arith.constant 2 : index
    %c0_32 = arith.constant 0 : index
    %c0_33 = arith.constant 0 : index
    %48 = vector.load %arg5[%c0_30, %c2_31, %c0_32, %c0_33] : memref<1x4x8x128xf32, #tpu.memory_space<vmem>>, vector<1x1x8x128xf32>
    %49 = vector.shape_cast %48 : vector<1x1x8x128xf32> to vector<8x128xf32>
    %50 = vector.shape_cast %47 : vector<8x128xf32> to vector<1x1x8x128xf32>
    tpu.vector_store %arg5[%c0_30, %c2_31, %c0_32, %c0_33], %50 {strides = array<i32>} : memref<1x4x8x128xf32, #tpu.memory_space<vmem>>, vector<1x1x8x128xf32>,
    %c0_34 = arith.constant 0 : index
    %c3 = arith.constant 3 : index
    %c0_35 = arith.constant 0 : index
    %c0_36 = arith.constant 0 : index
    %51 = vector.load %arg5[%c0_34, %c3, %c0_35, %c0_36] : memref<1x4x8x128xf32, #tpu.memory_space<vmem>>, vector<1x1x8x128xf32>
    %52 = vector.shape_cast %51 : vector<1x1x8x128xf32> to vector<8x128xf32>
    %53 = arith.addf %52, %32 : vector<8x128xf32>
    %c0_37 = arith.constant 0 : index
    %c3_38 = arith.constant 3 : index
    %c0_39 = arith.constant 0 : index
    %c0_40 = arith.constant 0 : index
    %54 = vector.load %arg5[%c0_37, %c3_38, %c0_39, %c0_40] : memref<1x4x8x128xf32, #tpu.memory_space<vmem>>, vector<1x1x8x128xf32>
    %55 = vector.shape_cast %54 : vector<1x1x8x128xf32> to vector<8x128xf32>
    %56 = vector.shape_cast %53 : vector<8x128xf32> to vector<1x1x8x128xf32>
    tpu.vector_store %arg5[%c0_37, %c3_38, %c0_39, %c0_40], %56 {strides = array<i32>} : memref<1x4x8x128xf32, #tpu.memory_space<vmem>>, vector<1x1x8x128xf32>,
    return
  }
  func.func @transform_0(%arg0: i32, %arg1: i32) -> (i32, i32) {
    %c1_i32 = arith.constant 1 : i32
    %0 = arith.muli %arg0, %c1_i32 : i32
    %1 = arith.addi %0, %arg1 : i32
    %c1_i32_0 = arith.constant 1 : i32
    %2 = arith.minsi %1, %c1_i32_0 : i32
    %c0_i32 = arith.constant 0 : i32
    %c0_i32_1 = arith.constant 0 : i32
    return %2, %c0_i32 : i32, i32
  }
  func.func @transform_1(%arg0: i32, %arg1: i32) -> (i32, i32) {
    %c1_i32 = arith.constant 1 : i32
    %0 = arith.muli %arg0, %c1_i32 : i32
    %1 = arith.addi %0, %arg1 : i32
    %c1_i32_0 = arith.constant 1 : i32
    %2 = arith.minsi %1, %c1_i32_0 : i32
    %c0_i32 = arith.constant 0 : i32
    %c0_i32_1 = arith.constant 0 : i32
    return %2, %c0_i32 : i32, i32
  }
  func.func @transform_2(%arg0: i32, %arg1: i32) -> (i32, i32) {
    %c0_i32 = arith.constant 0 : i32
    %c0_i32_0 = arith.constant 0 : i32
    %c0_i32_1 = arith.constant 0 : i32
    return %c0_i32, %c0_i32_0 : i32, i32
  }
  func.func @transform_3(%arg0: i32, %arg1: i32) -> (i32, i32, i32, i32) {
    %c0_i32 = arith.constant 0 : i32
    %c0_i32_0 = arith.constant 0 : i32
    %c0_i32_1 = arith.constant 0 : i32
    %c0_i32_2 = arith.constant 0 : i32
    return %arg0, %c0_i32, %c0_i32_0, %c0_i32_1 : i32, i32, i32, i32
  }
}

</mosaic_0001>

<bundles_post_ra>
// kernel: tpu_custom_call.1
= control target key start
LH: loop header
LB: loop body
LE: loop exit
PB: predicated region body
PF: predicated region fallthrough
CT: control target
= control target key end

     0   :  { %s1049_s0 = inlined_call_operand.hbm [shape: f32[18,128], index: 0, kind: input, shape index: {}]   ;;  %s1050_s1 = inlined_call_operand.hbm [shape: f32[18,128], index: 1, kind: input, shape index: {}]   ;;  %s1051_s2 = inlined_call_operand.<no memory space> [shape: f32[1,1], index: 2, kind: input, shape index: {}]   ;;  %s1052_s3 = inlined_call_operand.hbm [shape: f32[2,4,8,128], index: 3, kind: output, shape index: {}]  }
   0x1   :  { %8 = sst [smem:[#allocation2]] %s1051_s2 }
   0x2   :  { %9 = vsyncpa [#allocation4], 0 }
   0x3   :  { %11 = vsyncpa [#allocation4 + $0x1], 0 }
   0x4   :  { %12 = vsyncpa [#allocation7], 0 }
   0x5   :  { %14 = vsyncpa [#allocation7 + $0x1], 0 }
   0x6   :  { %15 = vsyncpa [#allocation5], 0 }
   0x7   :  { %17 = vsyncpa [#allocation5 + $0x1], 0  ;;  %s788_s14 = smov 0   ;;  %s790_s15 = smov 0  }
   0x8   :  { %s792_s16 = smov 0   ;;  %s794_s17 = smov 0  }
   0x9   :  { %s796_s18 = smov 0   ;;  %s798_s19 = smov 0  }
   0xa   :  { %s800_s20 = smov 0   ;;  %s802_s2 = smov 0  }
   0xb   :  { %s804_s21 = smov 0  }
   0xc LB: > { %s463_s22 = sadd.s32 4294967295, %s754_s21   ;;  %s464_s23 = sadd.s32 4294967294, %s754_s21   ;;  %s754_s21 = sphi %s804_s21, %s23_s21   ;;  %s750_s2 = sphi %s802_s2, %s1072_s2   ;;  %s746_s20 = sphi %s800_s20, %s1071_s20   ;;  %s742_s19 = sphi %s798_s19, %s1070_s19   ;;  %s738_s18 = sphi %s796_s18, %s1069_s18   ;;  %s734_s17 = sphi %s794_s17, %s1068_s17   ;;  %s730_s16 = sphi %s792_s16, %s1067_s16   ;;  %s726_s15 = sphi %s790_s15, %s1066_s15   ;;  %s722_s14 = sphi %s788_s14, %s1065_s14  }
   0xd   : > { %s35_s24 = sadd.s32 1, %s750_s2  ;;  %p40_p0 = scmp.lt.s32.totalorder %s750_s2, 1 }
   0xe   : > { %p37_p1 = scmp.ge.s32.totalorder %s35_s24, 2  ;;  %s48_s25 = sadd.s32 1, %s742_s19 }
   0xf   : > { %s837_s26 = scalar_select %p40_p0, %s750_s2, 1 }
  0x10   : > { %s1074_s24 = smov (%p37_p1, %s35_s24), 0  ;;  %p55_p2 = scmp.ne.s32.totalorder %s742_s19, %s738_s18 }
  0x11   : > { %1056 = sst [smem:[#allocation12_spill]] %s1074_s24  ;;  %p56_p3 = scmp.eq.s32.totalorder %s754_s21, 0 }
  0x12   : > { %p43_p4 = scmp.lt.s32.totalorder %s1074_s24, 1  ;;  %p61_p5 = scmp.ne.s32.totalorder %s738_s18, %s734_s17 }
  0x13   : > { %p846_p6 = por %p56_p3, %p55_p2  ;;  %p62_p7 = scmp.eq.s32.totalorder %s463_s22, 0 }
  0x14   : > { %s44_s28 = scalar_select %p43_p4, %s1074_s24, 1 }
  0x15   : > { %p851_p8 = por %p62_p7, %p61_p5  ;;  %s124_s30 = ssub.s32 %s750_s2, %s1074_s24 }
  0x16   : > { %s45_s4 = ssub.s32 %s837_s26, %s44_s28  ;;  %p125_p9 = scmp.eq.s32.totalorder %s124_s30, 0 }
  0x17   : > { %p46_p10 = scmp.eq.s32.totalorder %s45_s4, 0  ;;  %s127_s5 = sadd.s32 1, %s730_s16 }
  0x18   : > { %s860_s6 = scalar_select %p125_p9, %s730_s16, %s127_s5  }
  0x19   : > { %s863_s7 = scalar_select %p46_p10, %s742_s19, %s48_s25  }
  0x1a   : > { %p137_p11 = scmp.ne.s32.totalorder %s730_s16, %s726_s15  ;;  %p138_p12 = scmp.eq.s32.totalorder %s463_s22, 1 }
  0x1b   : > { %p143_p13 = scmp.ne.s32.totalorder %s726_s15, %s722_s14  ;;  %p144_p0 = scmp.eq.s32.totalorder %s464_s23, 1 }
  0x1c   : > { %p869_p1 = por %p138_p12, %p137_p11  ;;  %p1054_p3 = scmp.ge.s32.totalorder %s754_s21, 2 }
  0x1d   : > { %p873_p2 = por %p144_p0, %p143_p13 }
  0x1e   : > { %s1059_s8 = scalar_select %p869_p1, 1, 0 }
  0x1f   : > { %s1060_s9 = scalar_select %p873_p2, 1, 0 }
  0x20   : > { %163 = sbr.rel (%p1054_p3) target bundleno = 109 (0x6d), region = 20 }
  0x27   : > { %166 = sbr.rel (!%p846_p6) target bundleno = 74 (0x4a), region = 24  ;;  %s167_s10 = sand.u32 (%p846_p6), 1, %s742_s19  }
  0x28   : > { %s468_s11 = sshll.u32 (%p846_p6), %s837_s26, 1  ;;  %s467_s12 = sshll.u32 (%p846_p6), %s167_s10, 4 }
  0x29   : > { %s176_s13 = ssub.s32 (%p846_p6), 3, %s468_s11  ;;  %s887_s23 = scalar_lea.sflag (%p846_p6), [#allocation4], %s167_s10 }
  0x2a   : > { %p177_p4 = scmp.lt.s32.totalorder (%p846_p6), %s176_s13, 2  ;;  %s171_s25 = scalar_lea.vmem (%p846_p6), [#allocation3], %s467_s12 }
  0x2e   : > { %s1076_s13 = smov (!%p177_p4, %s176_s13), 2 }
  0x2f   : > { %s884_s17 = sshll.u32 %s1076_s13, 7 }
  0x30   : > { %s181_s22 = ssub.s32 256, %s884_s17 }
  0x31   : > { %182 = vsyncadd %s887_s23, %s181_s22  ;;  %p470_p5 = scmp.ne.s32.totalorder %s884_s17, 0  ;;  %s497_s28 = sshll.u32 %s837_s26, 8 }
  0x32   : > { %s895_s5 = scalar_lea.hbm %s1049_s0, %s497_s28  ;;  %s187_s10 = sshll.u32 %s171_s25, 4  ;;  %s897_s10 = int_to_ptr.vmem [resolvable:$true] %s187_s10 }
  0x33   : > { %s588_s11 = scalar_lea.hbm %s895_s5, %s884_s17  ;;  %s592_s22 = scalar_lea.hbm %s1049_s0, 384 }
  0x34   : > { %p589_p7 = scmp.ne.s32.totalorder %s895_s5, %s588_s11  ;;  %p593_p11 = scmp.lt.u32.totalorder %s895_s5, %s1049_s0 }
  0x35   : > { %p594_p12 = scmp.lt.u32.totalorder %s592_s22, %s588_s11  ;;  %p596_p0 = scmp.lt.u32.totalorder %s588_s11, %s895_s5 }
  0x36   : > { %p590_p9 = pnand %p589_p7, %p470_p5 }
  0x37   : > { %p595_p13 = por %p594_p12, %p593_p11 }
  0x38   : > { %p591_p10 = pneg %p590_p9 }
  0x39   : > { %p597_p4 = por %p596_p0, %p595_p13 }
  0x3b   : > { %p598_p3 = pnand %p597_p4, %p591_p10 }
  0x3d   : > { %601 = shalt.err (!%p598_p3)
}
  0x3e   : > { %s602_s25 = scalar_lea.vmem %s897_s10, %s884_s17  ;;  %s756_s28 = smov [#allocation3]  }
  0x3f   : > { %p603_p7 = scmp.ne.s32.totalorder %s897_s10, %s602_s25  ;;  %s606_s4 = sshll.u32 %s756_s28, 4  ;;  %s607_s4 = int_to_ptr.vmem [resolvable:$false] %s606_s4 }
  0x40   : > { %s608_s24 = scalar_lea.vmem %s607_s4, 512  ;;  %p609_p1 = scmp.lt.s32.totalorder %s897_s10, %s607_s4 }
  0x41   : > { %p604_p9 = pnand %p603_p7, %p470_p5  ;;  %p610_p11 = scmp.lt.s32.totalorder %s608_s24, %s602_s25 }
  0x43   : > { %p605_p2 = pneg %p604_p9  ;;  %p611_p12 = por %p610_p11, %p609_p1 }
  0x45   : > { %p612_p13 = pnand %p611_p12, %p605_p2 }
  0x47   : > { %615 = shalt.err (!%p612_p13)
}
  0x48   : > { %s757_s11 = smov 128   ;;  %s758_s12 = smov 8  }
  0x49   : > { %193 = dma.hbm_to_vmem [thread:$0]  (%p470_p5), %s895_s5, %s884_s17, %s897_s10, %s887_s23, %s757_s11, %s757_s11, %s758_s12  }
  0x4a PF: > { %196 = sbr.rel (!%p846_p6) target bundleno = 109 (0x6d), region = 28  ;;  %s197_s13 = sand.u32 (%p846_p6), 1, %s742_s19  }
  0x4b   : > { %s475_s22 = sshll.u32 (%p846_p6), %s837_s26, 1  ;;  %s474_s30 = sshll.u32 (%p846_p6), %s197_s13, 4 }
  0x4c   : > { %s206_s25 = ssub.s32 (%p846_p6), 3, %s475_s22  ;;  %s931_s24 = scalar_lea.sflag (%p846_p6), [#allocation7], %s197_s13 }
  0x4d   : > { %p207_p1 = scmp.lt.s32.totalorder (%p846_p6), %s206_s25, 2  ;;  %s201_s17 = scalar_lea.vmem (%p846_p6), [#allocation6], %s474_s30 }
  0x51   : > { %s1078_s25 = smov (!%p207_p1, %s206_s25), 2 }
  0x52   : > { %s928_s28 = sshll.u32 %s1078_s25, 7 }
  0x53   : > { %s211_s4 = ssub.s32 256, %s928_s28 }
  0x54   : > { %212 = vsyncadd %s931_s24, %s211_s4  ;;  %p477_p6 = scmp.ne.s32.totalorder %s928_s28, 0  ;;  %s498_s27 = sshll.u32 %s837_s26, 8 }
  0x55   : > { %s939_s10 = scalar_lea.hbm %s1050_s1, %s498_s27  ;;  %s217_s11 = sshll.u32 %s201_s17, 4  ;;  %s941_s11 = int_to_ptr.vmem [resolvable:$true] %s217_s11 }
  0x56   : > { %s616_s12 = scalar_lea.hbm %s939_s10, %s928_s28  ;;  %s620_s26 = scalar_lea.hbm %s1050_s1, 384 }
  0x57   : > { %p617_p2 = scmp.ne.s32.totalorder %s939_s10, %s616_s12  ;;  %p621_p10 = scmp.lt.u32.totalorder %s939_s10, %s1050_s1 }
  0x58   : > { %p622_p0 = scmp.lt.u32.totalorder %s620_s26, %s616_s12  ;;  %p624_p7 = scmp.lt.u32.totalorder %s616_s12, %s939_s10 }
  0x59   : > { %p618_p3 = pnand %p617_p2, %p477_p6 }
  0x5a   : > { %p623_p4 = por %p622_p0, %p621_p10 }
  0x5b   : > { %p619_p5 = pneg %p618_p3 }
  0x5c   : > { %p625_p9 = por %p624_p7, %p623_p4 }
  0x5e   : > { %p626_p11 = pnand %p625_p9, %p619_p5 }
  0x60   : > { %629 = shalt.err (!%p626_p11)
}
  0x61   : > { %s630_s4 = scalar_lea.vmem %s941_s11, %s928_s28  ;;  %s759_s17 = smov [#allocation6]  }
  0x62   : > { %p631_p12 = scmp.ne.s32.totalorder %s941_s11, %s630_s4  ;;  %s634_s27 = sshll.u32 %s759_s17, 4  ;;  %s635_s27 = int_to_ptr.vmem [resolvable:$false] %s634_s27 }
  0x63   : > { %s636_s23 = scalar_lea.vmem %s635_s27, 512  ;;  %p637_p2 = scmp.lt.s32.totalorder %s941_s11, %s635_s27 }
  0x64   : > { %p632_p13 = pnand %p631_p12, %p477_p6  ;;  %p638_p3 = scmp.lt.s32.totalorder %s636_s23, %s630_s4 }
  0x66   : > { %p633_p1 = pneg %p632_p13  ;;  %p639_p10 = por %p638_p3, %p637_p2 }
  0x68   : > { %p640_p0 = pnand %p639_p10, %p633_p1 }
  0x6a   : > { %643 = shalt.err (!%p640_p0)
}
  0x6b   : > { %s760_s5 = smov 128   ;;  %s761_s12 = smov 8  }
  0x6c   : > { %223 = dma.hbm_to_vmem [thread:$0]  (%p477_p6), %s939_s10, %s928_s28, %s941_s11, %s931_s24, %s760_s5, %s760_s5, %s761_s12  }
  0x6d PF: > { %p481_p5 = scmp.ge.s32.totalorder %s754_s21, 1  ;;  %p225_p4 = scmp.lt.s32.totalorder %s754_s21, 3 }
  0x6f   : > { %p226_p7 = pnand %p481_p5, %p225_p4 }
  0x70   : > { %s231_s13 = sand.u32 (!%p226_p7), 1, %s738_s18  }
  0x71   : > { %229 = sbr.rel (%p226_p7) target bundleno = 153 (0x99), region = 32  ;;  %s482_s22 = sshll.u32 (!%p226_p7), %s231_s13, 4 }
  0x72   : > { %s232_s26 = scalar_lea.sflag (!%p226_p7), [#allocation4], %s231_s13  ;;  %s235_s30 = scalar_lea.vmem (!%p226_p7), [#allocation3], %s482_s22 }
  0x78   : > { %709 = dma.done.wait (%p851_p8), %s232_s26, 256  }
  0x79   : > { %711 = vsyncadd (%p851_p8), %s232_s26, 4294967040  ;;  %s241_s28 = scalar_lea.sflag [#allocation7], %s231_s13  ;;  %s244_s24 = scalar_lea.vmem [#allocation6], %s482_s22 }
  0x7a   : > { %713 = dma.done.wait (%p851_p8), %s241_s28, 256  }
  0x7b   : > { %715 = vsyncadd (%p851_p8), %s241_s28, 4294967040  ;;  %s485_s10 = sshll.u32 %s746_s20, 4  ;;  %v303_v0 = vlaneseq  ;;  %s296_s11 = sld [smem:[#allocation2]]  ;;  %v299_v6 = vld [vmem:[%s235_s30] sm:$0xff]  ;;  %v300_v7 = vld [vmem:[%s235_s30 + $0x8] sm:$0xff] }
  0x7c   : > { %v306_v1 = vstv %s485_s10  ;;  %s269_s25 = sand.u32 1, %s726_s15   ;;  %v301_v8 = vld [vmem:[%s244_s24] sm:$0xff]  ;;  %v302_v10 = vld [vmem:[%s244_s24 + $0x8] sm:$0xff]  ;;  %s499_s29 = sshll.u32 %s746_s20, 9 }
  0x7d   : > { %v304_v2 = vshrl.u32 %v303_v0, 7  ;;  %s484_s4 = sshll.u32 %s269_s25, 5  ;;  %v311_v11 = vsub.f32 %v299_v6, %v301_v8  ;;  %v312_v13 = vsub.f32 %v300_v7, %v302_v10  ;;  %s987_s12 = scalar_lea.hbm %s1052_s3, %s499_s29 }
  0x7e   : > { %s271_s17 = scalar_lea.vmem [#allocation8], %s484_s4  ;;  %s993_s20 = scalar_lea.sflag [#allocation5], %s269_s25 }
  0x7f   : > { %v305_v3 = vadd.s32 8, %v304_v2  ;;  %v307_v4 = vadd.s32 %v306_v1, %v304_v2  ;;  %s359_s27 = sshll.u32 %s271_s17, 4  ;;  %p1061_p6 = scmp.ne.s32.totalorder %s1059_s8, 0  ;;  %s989_s27 = int_to_ptr.vmem [resolvable:$true] %s359_s27 }
  0x80   : > { %s644_s13 = scalar_lea.vmem %s989_s27, 512  ;;  %s762_s22 = smov [#allocation8]  }
  0x81   : > { %v308_v5 = vadd.s32 %v306_v1, %v305_v3  ;;  %vm309_vm0 = vcmp.lt.s32.totalorder %v307_v4, 18  ;;  %v315_v9 = vstv %s296_s11  ;;  %p645_p8 = scmp.ne.s32.totalorder %s989_s27, %s644_s13  ;;  %s648_s26 = sshll.u32 %s762_s22, 4  ;;  %s649_s26 = int_to_ptr.vmem [resolvable:$false] %s648_s26 }
  0x82   : > { %v316_v12 = vsub.f32 %v301_v8, %v315_v9  ;;  %v317_v14 = vsub.f32 %v302_v10, %v315_v9  ;;  %v313_v15 = vsel %vm309_vm0, %v311_v11, 0.0  ;;  %s650_s30 = scalar_lea.vmem %s649_s26, 1024  ;;  %p651_p12 = scmp.lt.s32.totalorder %s989_s27, %s649_s26 }
  0x83   : > { %vm310_vm1 = vcmp.lt.s32.totalorder %v308_v5, 18  ;;  %v320_v18 = vmul.f32 %v313_v15, %v313_v15  ;;  %v323_v19 = vand.u32 2147483647, %v313_v15  ;;  %p646_p9 = pnand %p645_p8, %p1061_p6  ;;  %p652_p13 = scmp.lt.s32.totalorder %s650_s30, %s644_s13 }
  0x84   : > { %v318_v16 = vsel %vm309_vm0, %v316_v12, 0.0  ;;  %v314_v17 = vsel %vm310_vm1, %v312_v13, 0.0  ;;  %v319_v20 = vsel %vm310_vm1, %v317_v14, 0.0 }
  0x85   : > { %v321_v21 = vmul.f32 %v314_v17, %v314_v17  ;;  %v324_v22 = vand.u32 2147483647, %v314_v17  ;;  %v326_v23 = vadd.f32 %v319_v20, %v318_v16  ;;  %v327_v24 = vmul.f32 %v318_v16, %v318_v16  ;;  %p647_p11 = pneg %p646_p9  ;;  %p653_p1 = por %p652_p13, %p651_p12 }
  0x86   : > { %v328_v25 = vmul.f32 %v319_v20, %v319_v20 }
  0x87   : > { %v322_v26 = vadd.f32 %v321_v21, %v320_v18  ;;  %v325_v27 = vadd.f32 %v324_v22, %v323_v19  ;;  %489 = vst [vmem:[%s271_s17 + $0x10] sm:$0xff] %v326_v23  ;;  %p654_p2 = pnand %p653_p1, %p647_p11 }
  0x88   : > { %v329_v28 = vadd.f32 %v328_v25, %v327_v24 }
  0x89   : > { %332 = vst [vmem:[%s271_s17] sm:$0xff] %v322_v26  ;;  %487 = vst [vmem:[%s271_s17 + $0x8] sm:$0xff] %v325_v27 }
  0x8a   : > { %491 = vst [vmem:[%s271_s17 + $0x18] sm:$0xff] %v329_v28 }
  0x8b   : > { %657 = shalt.err (!%p654_p2)
}
  0x8c   : > { %s658_s28 = scalar_lea.hbm %s987_s12, 512  ;;  %s662_s11 = scalar_lea.hbm %s1052_s3, 1024 }
  0x8d   : > { %p659_p3 = scmp.ne.s32.totalorder %s987_s12, %s658_s28  ;;  %p663_p5 = scmp.lt.u32.totalorder %s987_s12, %s1052_s3 }
  0x8e   : > { %p664_p4 = scmp.lt.u32.totalorder %s662_s11, %s658_s28  ;;  %p666_p8 = scmp.lt.u32.totalorder %s658_s28, %s987_s12 }
  0x8f   : > { %p660_p10 = pnand %p659_p3, %p1061_p6 }
  0x90   : > { %p665_p7 = por %p664_p4, %p663_p5 }
  0x91   : > { %p661_p0 = pneg %p660_p10 }
  0x92   : > { %p667_p9 = por %p666_p8, %p665_p7 }
  0x94   : > { %p668_p11 = pnand %p667_p9, %p661_p0 }
  0x96   : > { %671 = shalt.err (!%p668_p11)
}
  0x97   : > { %s763_s29 = smov 128   ;;  %s764_s17 = smov 8  }
  0x98   : > { %502 = dma.vmem_to_hbm [thread:$0]  (%p1061_p6), %s989_s27, 512, %s987_s12, %s993_s20, %s763_s29, %s763_s29, %s764_s17  }
  0x99 PF: > { %s374_s23 = sand.u32 1, %s722_s14   ;;  %p1062_p12 = scmp.ne.s32.totalorder %s1060_s9, 0 }
  0x9a   : > { %p1063_p13 = scmp.ge.s32.totalorder %s754_s21, 2  ;;  %s375_s5 = scalar_lea.sflag [#allocation5], %s374_s23 }
  0x9c   : > { %p505_p1 = pnand %p1063_p13, %p1062_p12 }
  0x9e   : > { %717 = dma.done.wait (!%p505_p1), %s375_s5, 512  }
  0x9f   : > { %719 = vsyncadd (!%p505_p1), %s375_s5, 4294966784  ;;  %s23_s21 = sadd.s32 1, %s754_s21   ;;  %s1064_s8 = sld [smem:[#allocation12_spill]] }
  0xa0   : > { %p20_p2 = scmp.ge.s32.totalorder %s23_s21, 4   ;;  %s1065_s14 = smov %s726_s15 }
  0xa1   : > { %s1066_s15 = smov %s730_s16  ;;  %s1067_s16 = smov %s860_s6 }
  0xa2   : > { %s1068_s17 = smov %s738_s18  ;;  %s1069_s18 = smov %s742_s19 }
  0xa3   : > { %s1070_s19 = smov %s863_s7  ;;  %s1071_s20 = smov %s750_s2 }
  0xa4   :  { %22 = sbr.rel (!%p20_p2) target bundleno = 12 (0xc), region = 97 }
  0xa5   : > { %s1072_s2 = smov %s1064_s8 }
  0xab   :  { %380 = vsyncpa [#allocation4], 1 }
  0xac   :  { %382 = vsyncpa [#allocation4 + $0x1], 1 }
  0xad   :  { %383 = vsyncpa [#allocation7], 1 }
  0xae   :  { %385 = vsyncpa [#allocation7 + $0x1], 1 }
  0xaf   :  { %386 = vsyncpa [#allocation5], 1 }
  0xb0   :  { %388 = vsyncpa [#allocation5 + $0x1], 1 }

</bundles_post_ra>
